<compile_context>
chip_gen: v7x
topology: tpu7x:2x2x1
jax: 0.10.0
libtpu: 0.0.40
codegen_flags: <defaults>
</compile_context>

<pallas_src>
import functools

import jax
import jax.numpy as jnp
from jax.experimental import pallas as pl
from jax.experimental.pallas import tpu as pltpu

EPS = 1e-5
_LANE = 128
_VMEM_LIMIT = 32 * 1024 * 1024     # scoped-VMEM budget safe on v5e / v6e / v7x
_TILE_BUDGET = 4 * 1024 * 1024     # bytes per (nb, C, hw_tile) block (2 -> 4 MiB)
_FUSED_LIMIT = 2 * 1024 * 1024     # f32 bytes of the whole activation -> fuse


def _pick_block(n, c, hw, itemsize, budget):
    """hw must be a multiple of 128 (the wrapper pads).  Returns (nb, hw_tile):
    hw_tile = largest multiple of 128 dividing hw under the byte budget,
    nb = largest divisor of n keeping one (nb, C, hw_tile) block under it."""
    cap = max(_LANE, budget // max(1, c * itemsize))
    hw_tile = _LANE
    for t in range(_LANE, hw + 1, _LANE):
        if hw % t == 0 and t <= cap:
            hw_tile = t
    row_bytes = c * hw_tile * itemsize
    nb = 1
    for t in range(1, n + 1):
        if n % t == 0 and t * row_bytes <= budget:
            nb = t
    return nb, hw_tile


def _maybe_buffered(block_shape, index_map, n_buffers=None):
    """BlockSpec with a deeper pipeline when requested & supported; the stats
    pass is input-only, so a third buffer is VMEM-cheap.  Falls back cleanly."""
    if n_buffers is not None and hasattr(pl, "Buffered"):
        try:
            return pl.BlockSpec(block_shape, index_map,
                                pipeline_mode=pl.Buffered(n_buffers))
        except TypeError:
            pass
    return pl.BlockSpec(block_shape, index_map)


# ------------------------------- kernels -----------------------------------

def _stats_kernel(x_ref, shift_ref, psum_ref, psq_ref):
    """Pass 1: lane-parallel shifted sum / sum-of-squares partials.

    Output blocks are (1, C, 128) per batch-block (grid axis 0, "parallel");
    they stay VMEM-resident and accumulate across the HW grid axis (axis 1,
    "arbitrary", innermost).  Per tile we only do VPU adds over 128-lane
    slabs — the single cross-lane reduce happens later, in plain JAX, on the
    tiny partials."""
    hi = pl.program_id(1)

    @pl.when(hi == 0)
    def _init():
        psum_ref[...] = jnp.zeros_like(psum_ref)
        psq_ref[...] = jnp.zeros_like(psq_ref)

    c_shift = shift_ref[...]                          # (1, C, 1) f32
    n_lb = x_ref.shape[2] // _LANE                    # lane-blocks per tile

    def body(k, carry):
        off = pl.multiple_of(k * _LANE, _LANE)
        slab = x_ref[:, :, pl.ds(off, _LANE)].astype(jnp.float32) - c_shift
        psum_ref[...] += jnp.sum(slab, axis=0, keepdims=True)
        psq_ref[...] += jnp.sum(slab * slab, axis=0, keepdims=True)
        return carry

    jax.lax.fori_loop(0, n_lb, body, 0, unroll=(n_lb <= 8))


def _scale_shift_kernel(x_ref, scale_ref, shift_ref, y_ref):
    """Pass 2 / eval: y = x * scale + shift (per-channel FMA, lane-dense)."""
    # TODO(synk): optional bf16 fast path on v6e/v7x (kept f32: HBM-bound).
    x = x_ref[...].astype(jnp.float32)
    y_ref[...] = (x * scale_ref[...] + shift_ref[...]).astype(y_ref.dtype)


def _fused_train_kernel(x_ref, df_ref, gm_ref, gv_ref, w_ref, b_ref,
                        y_ref, mean_ref, var_ref, *, inv_count, eps):
    """Single-pass training path for VMEM-resident activations:
    stats + blend + affine fold + normalize with one HBM read of x."""
    x = x_ref[...].astype(jnp.float32)                # (N, C, HW)
    c = gm_ref[...]                                   # shift for numerics
    xc = x - c
    d = jnp.sum(xc, axis=(0, 2), keepdims=True) * inv_count
    curr_mean = c + d
    curr_var = jnp.maximum(
        jnp.sum(xc * xc, axis=(0, 2), keepdims=True) * inv_count - d * d, 0.0)
    a = jax.nn.sigmoid(df_ref[...])
    mean = (1.0 - a) * gm_ref[...] + a * curr_mean
    var = (1.0 - a) * gv_ref[...] + a * curr_var
    inv_std = jax.lax.rsqrt(var + eps)
    scale = w_ref[...] * inv_std
    shift = b_ref[...] - mean * scale
    y_ref[...] = (x * scale + shift).astype(y_ref.dtype)
    mean_ref[...] = mean
    var_ref[...] = var


# ------------------------------- wrapper ------------------------------------

def _update_running(state, mean, var, curr_num):
    """Tiny (C,) glue mirroring the PyTorch running_* buffer side effect."""
    rn = state["running_num"].astype(jnp.float32)     # (1,)
    rm = state["running_mean"].astype(jnp.float32)    # (C,)
    rv = state["running_var"].astype(jnp.float32)     # (C,)
    all_num = rn + curr_num
    all_mean = (rn * rm + curr_num * mean) / all_num
    all_var = (rv * rn + var * curr_num
               + curr_num * (mean - all_mean) ** 2) / all_num
    do_update = rn[0] != -1.0
    new_state = dict(state)
    new_state["running_num"] = jnp.where(do_update, all_num, rn)
    new_state["running_mean"] = jnp.where(do_update, all_mean, rm)
    new_state["running_var"] = jnp.where(do_update, all_var, rv)
    return new_state


def hybrid_batch_norm(x_nchw, params, state, *, training=True, affine=True,
                      eps=EPS, tile_budget_bytes=_TILE_BUDGET,
                      fused_limit_bytes=_FUSED_LIMIT):
    """Functional HybridBatchNorm.forward.  Returns (y_nchw, new_state);
    new_state == state in eval mode."""
    N, C, H, W = x_nchw.shape
    HW = H * W
    itemsize = jnp.dtype(x_nchw.dtype).itemsize
    x3d = x_nchw.reshape(N, C, HW)                    # free reshape, stays NCHW

    def col(v):                                       # (C,) -> (1, C, 1) f32
        return jnp.asarray(v, jnp.float32).reshape(1, C, 1)

    if affine:
        w_f = params["weight"].astype(jnp.float32)
        b_f = params["bias"].astype(jnp.float32)
    else:
        w_f = jnp.ones((C,), jnp.float32)
        b_f = jnp.zeros((C,), jnp.float32)
    gm_f = state["global_mean"].astype(jnp.float32)
    gv_f = state["global_var"].astype(jnp.float32)

    def norm_call(x_in, scale_c, shift_c):
        n, c_, hw = x_in.shape                        # hw is a multiple of 128
        nb, hw_tile = _pick_block(n, c_, hw, itemsize, tile_budget_bytes)
        grid = (n // nb, hw // hw_tile)
        x_spec = pl.BlockSpec((nb, c_, hw_tile), lambda ni, hi: (ni, 0, hi))
        c_spec = pl.BlockSpec((1, c_, 1), lambda ni, hi: (0, 0, 0))
        return pl.pallas_call(
            _scale_shift_kernel,
            grid=grid,
            in_specs=[x_spec, c_spec, c_spec],
            out_specs=x_spec,
            out_shape=jax.ShapeDtypeStruct((n, c_, hw), x_in.dtype),
            compiler_params=pltpu.CompilerParams(
                dimension_semantics=("parallel", "parallel"),
                vmem_limit_bytes=_VMEM_LIMIT),
        )(x_in, scale_c.reshape(1, c_, 1), shift_c.reshape(1, c_, 1))

    if not training:
        # Eval: fold global stats + affine into one per-channel FMA.
        inv_std = jax.lax.rsqrt(gv_f + eps)
        scale_c = w_f * inv_std
        shift_c = b_f - gm_f * scale_c
        HWp = -(-HW // _LANE) * _LANE
        x_in = (jnp.pad(x3d, ((0, 0), (0, 0), (0, HWp - HW)))
                if HWp != HW else x3d)
        y3d = norm_call(x_in, scale_c, shift_c)
        if HWp != HW:
            y3d = y3d[:, :, :HW]
        return y3d.reshape(N, C, H, W), state

    # ------------------------------ training -------------------------------
    if "distribution_factor" not in params:
        raise ValueError(
            "training=True requires params['distribution_factor'] "
            "(the PyTorch module only defines it when affine=True).")
    df_f = params["distribution_factor"].astype(jnp.float32)

    if N * C * HW * 4 <= fused_limit_bytes:
        # Fused single-pass: x and y resident in VMEM, one HBM read of x.
        full_spec = pl.BlockSpec((N, C, HW), lambda i: (0, 0, 0))
        c_spec = pl.BlockSpec((1, C, 1), lambda i: (0, 0, 0))
        stat_shape = jax.ShapeDtypeStruct((1, C, 1), jnp.float32)
        y3d, mean3, var3 = pl.pallas_call(
            functools.partial(_fused_train_kernel,
                              inv_count=1.0 / float(N * HW), eps=eps),
            grid=(1,),
            in_specs=[full_spec, c_spec, c_spec, c_spec, c_spec, c_spec],
            out_specs=[full_spec, c_spec, c_spec],
            out_shape=(jax.ShapeDtypeStruct((N, C, HW), x_nchw.dtype),
                       stat_shape, stat_shape),
            compiler_params=pltpu.CompilerParams(
                vmem_limit_bytes=_VMEM_LIMIT),
        )(x3d, col(df_f), col(gm_f), col(gv_f), col(w_f), col(b_f))
        mean = mean3.reshape(C)
        var = var3.reshape(C)
    else:
        # Two-pass tiled path.  Pad HW to a multiple of 128 so every tile is
        # lane-dense and the (8,128) rule holds; padded zeros are corrected
        # exactly in the finalize (inv_count uses the true N*HW).
        HWp = -(-HW // _LANE) * _LANE
        x_in = (jnp.pad(x3d, ((0, 0), (0, 0), (0, HWp - HW)))
                if HWp != HW else x3d)
        nb, hw_tile = _pick_block(N, C, HWp, itemsize, tile_budget_bytes)
        grid = (N // nb, HWp // hw_tile)

        x_spec = _maybe_buffered((nb, C, hw_tile), lambda ni, hi: (ni, 0, hi),
                                 n_buffers=3 if grid[1] >= 4 else None)
        c_spec = pl.BlockSpec((1, C, 1), lambda ni, hi: (0, 0, 0))
        part_spec = pl.BlockSpec((1, C, _LANE), lambda ni, hi: (ni, 0, 0))
        part_shape = jax.ShapeDtypeStruct((grid[0], C, _LANE), jnp.float32)

        psum, psq = pl.pallas_call(
            _stats_kernel,
            grid=grid,
            in_specs=[x_spec, c_spec],
            out_specs=[part_spec, part_spec],
            out_shape=(part_shape, part_shape),
            compiler_params=pltpu.CompilerParams(
                dimension_semantics=("parallel", "arbitrary"),
                vmem_limit_bytes=_VMEM_LIMIT),
        )(x_in, col(gm_f))

        # Finalize on tiny (C,) vectors in plain JAX (one-shot EUP/XLU work):
        # undo padding contributions, un-shift, blend, fold the affine.
        count = jnp.float32(N * HW)
        pad_elems = jnp.float32(N * (HWp - HW))
        s1 = jnp.sum(psum, axis=(0, 2)) + pad_elems * gm_f       # sum(x - gm)
        s2 = jnp.sum(psq, axis=(0, 2)) - pad_elems * gm_f * gm_f  # sum((x-gm)^2)
        d = s1 / count
        curr_mean = gm_f + d
        curr_var = jnp.maximum(s2 / count - d * d, 0.0)          # biased
        a = jax.nn.sigmoid(df_f)
        mean = (1.0 - a) * gm_f + a * curr_mean
        var = (1.0 - a) * gv_f + a * curr_var
        inv_std = jax.lax.rsqrt(var + eps)
        scale_c = w_f * inv_std
        shift_c = b_f - mean * scale_c

        y3d = norm_call(x_in, scale_c, shift_c)
        if HWp != HW:
            y3d = y3d[:, :, :HW]

    new_state = _update_running(state, mean, var, jnp.float32(N))
    return y3d.reshape(N, C, H, W), new_state


# ----------------------------- pure-JAX references --------------------------

def _reference_train(x, params, state, eps=EPS):
    curr_num = x.shape[0]
    curr_mean = x.mean(axis=(0, 2, 3))
    curr_var = x.var(axis=(0, 2, 3))                   # biased (unbiased=False)
    a = jax.nn.sigmoid(params["distribution_factor"])
    mean = (1 - a) * state["global_mean"] + a * curr_mean
    var = (1 - a) * state["global_var"] + a * curr_var
    rn, rm, rv = (state["running_num"], state["running_mean"],
                  state["running_var"])
    all_num = rn + curr_num
    all_mean = (rn * rm + curr_num * mean) / all_num
    all_var = (rv * rn + var * curr_num +
               curr_num * (mean - all_mean) ** 2) / all_num
    new_state = dict(state, running_num=all_num, running_mean=all_mean,
                     running_var=all_var)
    xn = (x - mean[None, :, None, None]) / jnp.sqrt(var[None, :, None, None] + eps)
    y = (xn * params["weight"][None, :, None, None]
         + params["bias"][None, :, None, None])
    return y, new_state


def _reference_eval(x, params, state, eps=EPS):
    mean = state["global_mean"][None, :, None, None]
    var = state["global_var"][None, :, None, None]
    xn = (x - mean) / jnp.sqrt(var + eps)
    return (xn * params["weight"][None, :, None, None]
            + params["bias"][None, :, None, None])


if __name__ == "__main__":
    key = jax.random.PRNGKey(0)
    k1, k2, k3 = jax.random.split(key, 3)

    def make_params_state(C, mean_offset=0.0):
        ar = jnp.arange(C, dtype=jnp.float32)
        params = {
            "distribution_factor": 0.3 * ar - 0.5,
            "weight": 1.0 + 0.1 * ar,
            "bias": 0.01 * ar,
        }
        state = {
            "running_num": jnp.ones((1,), jnp.float32),
            "running_mean": mean_offset + 0.05 * ar,
            "running_var": jnp.ones((C,), jnp.float32) + 0.1 * ar,
            "global_mean": mean_offset + 0.1 * ar,
            "global_var": 1.0 + 0.05 * ar,
        }
        return params, state

    def check(tag, got, want, atol=1e-4, rtol=1e-4):
        assert jnp.allclose(got, want, atol=atol, rtol=rtol), f"{tag} mismatch"

    # 1) base shape -> fused single-pass training path
    N, C, H, W = 2, 4, 16, 16
    x = jax.random.normal(k1, (N, C, H, W), dtype=jnp.float32)
    params, state = make_params_state(C)
    y_ref, st_ref = _reference_train(x, params, state)
    y, st = hybrid_batch_norm(x, params, state, training=True)
    jax.block_until_ready(y)
    check("fused y", y, y_ref)
    for kname in ("running_num", "running_mean", "running_var"):
        check(f"fused {kname}", st[kname], st_ref[kname])

    # 2) forced two-pass tiled path (multi-step grid: accumulate across the
    #    HW axis + per-batch-block partials on the parallel axis)
    y_t, st_t = hybrid_batch_norm(x, params, state, training=True,
                                  fused_limit_bytes=0, tile_budget_bytes=2048)
    jax.block_until_ready(y_t)
    check("tiled y", y_t, y_ref)
    for kname in ("running_num", "running_mean", "running_var"):
        check(f"tiled {kname}", st_t[kname], st_ref[kname])

    # 3) non-128-multiple spatial size: fused (no pad) and tiled (padded)
    N2, C2, H2, W2 = 2, 8, 10, 12
    x2 = jax.random.normal(k2, (N2, C2, H2, W2), dtype=jnp.float32)
    params2, state2 = make_params_state(C2)
    y2_ref, st2_ref = _reference_train(x2, params2, state2)
    y2a, _ = hybrid_batch_norm(x2, params2, state2, training=True)
    y2b, st2b = hybrid_batch_norm(x2, params2, state2, training=True,
                                  fused_limit_bytes=0, tile_budget_bytes=2048)
    jax.block_until_ready((y2a, y2b))
    check("fused non-aligned y", y2a, y2_ref)
    check("tiled padded y", y2b, y2_ref)
    check("tiled padded running_var", st2b["running_var"], st2_ref["running_var"])

    # 4) non-centered data: shifted-sum accumulation keeps variance accurate
    x3 = 50.0 + jax.random.normal(k3, (N, C, H, W), dtype=jnp.float32)
    params3, state3 = make_params_state(C, mean_offset=50.0)
    y3_ref, st3_ref = _reference_train(x3, params3, state3)
    y3, st3 = hybrid_batch_norm(x3, params3, state3, training=True,
                                fused_limit_bytes=0)
    jax.block_until_ready(y3)
    check("offset y", y3, y3_ref)
    check("offset running_var", st3["running_var"], st3_ref["running_var"])

    # 5) eval mode
    y_e, _ = hybrid_batch_norm(x, params, st, training=False)
    jax.block_until_ready(y_e)
    check("eval y", y_e, _reference_eval(x, params, st))

    print("KERNEL_OK")
</pallas_src>

<mosaic_0001>
module attributes {stable_mosaic.version = 11 : i64} {
  func.func @_fused_train_kernel(%arg0: i32, %arg1: memref<2x4x256xf32, #tpu.memory_space<vmem>>, %arg2: memref<1x4x1xf32, #tpu.memory_space<vmem>>, %arg3: memref<1x4x1xf32, #tpu.memory_space<vmem>>, %arg4: memref<1x4x1xf32, #tpu.memory_space<vmem>>, %arg5: memref<1x4x1xf32, #tpu.memory_space<vmem>>, %arg6: memref<1x4x1xf32, #tpu.memory_space<vmem>>, %arg7: memref<2x4x256xf32, #tpu.memory_space<vmem>>, %arg8: memref<1x4x1xf32, #tpu.memory_space<vmem>>, %arg9: memref<1x4x1xf32, #tpu.memory_space<vmem>>) attributes {dimension_semantics = [#tpu.dimension_semantics<arbitrary>], iteration_bounds = array<i64: 1>, scalar_prefetch = 0 : i64, scratch_operands = 0 : i64, tpu.core_type = #tpu.core_type<tc>, window_params = [{pipeline_mode = #tpu.pipeline_mode<synchronous>, transform_indices = @transform_0, window_bounds = array<i64: 2, 4, 256>}, {pipeline_mode = #tpu.pipeline_mode<synchronous>, transform_indices = @transform_1, window_bounds = array<i64: 1, 4, 1>}, {pipeline_mode = #tpu.pipeline_mode<synchronous>, transform_indices = @transform_2, window_bounds = array<i64: 1, 4, 1>}, {pipeline_mode = #tpu.pipeline_mode<synchronous>, transform_indices = @transform_3, window_bounds = array<i64: 1, 4, 1>}, {pipeline_mode = #tpu.pipeline_mode<synchronous>, transform_indices = @transform_4, window_bounds = array<i64: 1, 4, 1>}, {pipeline_mode = #tpu.pipeline_mode<synchronous>, transform_indices = @transform_5, window_bounds = array<i64: 1, 4, 1>}, {pipeline_mode = #tpu.pipeline_mode<synchronous>, transform_indices = @transform_6, window_bounds = array<i64: 2, 4, 256>}, {pipeline_mode = #tpu.pipeline_mode<synchronous>, transform_indices = @transform_7, window_bounds = array<i64: 1, 4, 1>}, {pipeline_mode = #tpu.pipeline_mode<synchronous>, transform_indices = @transform_8, window_bounds = array<i64: 1, 4, 1>}]} {
    %c0 = arith.constant 0 : index
    %c0_0 = arith.constant 0 : index
    %c0_1 = arith.constant 0 : index
    %0 = vector.load %arg1[%c0, %c0_0, %c0_1] : memref<2x4x256xf32, #tpu.memory_space<vmem>>, vector<2x4x256xf32>
    %c0_2 = arith.constant 0 : index
    %c0_3 = arith.constant 0 : index
    %c0_4 = arith.constant 0 : index
    %1 = vector.load %arg3[%c0_2, %c0_3, %c0_4] : memref<1x4x1xf32, #tpu.memory_space<vmem>>, vector<1x4x1xf32>
    %2 = vector.broadcast %1 : vector<1x4x1xf32> to vector<2x4x256xf32>
    %3 = arith.subf %0, %2 : vector<2x4x256xf32>
    %cst = arith.constant dense<0.000000e+00> : vector<4xf32>
    %4 = vector.multi_reduction <add>, %3, %cst [0, 2] : vector<2x4x256xf32> to vector<4xf32>
    %5 = vector.shape_cast %4 : vector<4xf32> to vector<1x4x1xf32>
    %cst_5 = arith.constant 0.001953125 : f32
    %6 = vector.broadcast %cst_5 : f32 to vector<1x4x1xf32>
    %7 = arith.mulf %5, %6 : vector<1x4x1xf32>
    %8 = arith.addf %1, %7 : vector<1x4x1xf32>
    %9 = arith.mulf %3, %3 : vector<2x4x256xf32>
    %cst_6 = arith.constant dense<0.000000e+00> : vector<4xf32>
    %10 = vector.multi_reduction <add>, %9, %cst_6 [0, 2] : vector<2x4x256xf32> to vector<4xf32>
    %11 = vector.shape_cast %10 : vector<4xf32> to vector<1x4x1xf32>
    %cst_7 = arith.constant 0.001953125 : f32
    %12 = vector.broadcast %cst_7 : f32 to vector<1x4x1xf32>
    %13 = arith.mulf %11, %12 : vector<1x4x1xf32>
    %14 = arith.mulf %7, %7 : vector<1x4x1xf32>
    %15 = arith.subf %13, %14 : vector<1x4x1xf32>
    %cst_8 = arith.constant 0.000000e+00 : f32
    %16 = vector.broadcast %cst_8 : f32 to vector<1x4x1xf32>
    %17 = arith.maximumf %15, %16 : vector<1x4x1xf32>
    %c0_9 = arith.constant 0 : index
    %c0_10 = arith.constant 0 : index
    %c0_11 = arith.constant 0 : index
    %18 = vector.load %arg2[%c0_9, %c0_10, %c0_11] : memref<1x4x1xf32, #tpu.memory_space<vmem>>, vector<1x4x1xf32>
    %19 = arith.negf %18 : vector<1x4x1xf32>
    %20 = math.exp %19 : vector<1x4x1xf32>
    %cst_12 = arith.constant 1.000000e+00 : f32
    %21 = vector.broadcast %cst_12 : f32 to vector<1x4x1xf32>
    %22 = arith.addf %21, %20 : vector<1x4x1xf32>
    %23 = arith.divf %21, %22 : vector<1x4x1xf32>
    %cst_13 = arith.constant 1.000000e+00 : f32
    %24 = vector.broadcast %cst_13 : f32 to vector<1x4x1xf32>
    %25 = arith.subf %24, %23 : vector<1x4x1xf32>
    %c0_14 = arith.constant 0 : index
    %c0_15 = arith.constant 0 : index
    %c0_16 = arith.constant 0 : index
    %26 = vector.load %arg3[%c0_14, %c0_15, %c0_16] : memref<1x4x1xf32, #tpu.memory_space<vmem>>, vector<1x4x1xf32>
    %27 = arith.mulf %25, %26 : vector<1x4x1xf32>
    %28 = arith.mulf %23, %8 : vector<1x4x1xf32>
    %29 = arith.addf %27, %28 : vector<1x4x1xf32>
    %cst_17 = arith.constant 1.000000e+00 : f32
    %30 = vector.broadcast %cst_17 : f32 to vector<1x4x1xf32>
    %31 = arith.subf %30, %23 : vector<1x4x1xf32>
    %c0_18 = arith.constant 0 : index
    %c0_19 = arith.constant 0 : index
    %c0_20 = arith.constant 0 : index
    %32 = vector.load %arg4[%c0_18, %c0_19, %c0_20] : memref<1x4x1xf32, #tpu.memory_space<vmem>>, vector<1x4x1xf32>
    %33 = arith.mulf %31, %32 : vector<1x4x1xf32>
    %34 = arith.mulf %23, %17 : vector<1x4x1xf32>
    %35 = arith.addf %33, %34 : vector<1x4x1xf32>
    %cst_21 = arith.constant 9.99999974E-6 : f32
    %36 = vector.broadcast %cst_21 : f32 to vector<1x4x1xf32>
    %37 = arith.addf %35, %36 : vector<1x4x1xf32>
    %38 = math.rsqrt %37 : vector<1x4x1xf32>
    %c0_22 = arith.constant 0 : index
    %c0_23 = arith.constant 0 : index
    %c0_24 = arith.constant 0 : index
    %39 = vector.load %arg5[%c0_22, %c0_23, %c0_24] : memref<1x4x1xf32, #tpu.memory_space<vmem>>, vector<1x4x1xf32>
    %40 = arith.mulf %39, %38 : vector<1x4x1xf32>
    %c0_25 = arith.constant 0 : index
    %c0_26 = arith.constant 0 : index
    %c0_27 = arith.constant 0 : index
    %41 = vector.load %arg6[%c0_25, %c0_26, %c0_27] : memref<1x4x1xf32, #tpu.memory_space<vmem>>, vector<1x4x1xf32>
    %42 = arith.mulf %29, %40 : vector<1x4x1xf32>
    %43 = arith.subf %41, %42 : vector<1x4x1xf32>
    %44 = vector.broadcast %40 : vector<1x4x1xf32> to vector<2x4x256xf32>
    %45 = arith.mulf %0, %44 : vector<2x4x256xf32>
    %46 = vector.broadcast %43 : vector<1x4x1xf32> to vector<2x4x256xf32>
    %47 = arith.addf %45, %46 : vector<2x4x256xf32>
    %c0_28 = arith.constant 0 : index
    %c0_29 = arith.constant 0 : index
    %c0_30 = arith.constant 0 : index
    %48 = vector.load %arg7[%c0_28, %c0_29, %c0_30] : memref<2x4x256xf32, #tpu.memory_space<vmem>>, vector<2x4x256xf32>
    tpu.vector_store %arg7[%c0_28, %c0_29, %c0_30], %47 {strides = array<i32>} : memref<2x4x256xf32, #tpu.memory_space<vmem>>, vector<2x4x256xf32>,
    %c0_31 = arith.constant 0 : index
    %c0_32 = arith.constant 0 : index
    %c0_33 = arith.constant 0 : index
    %49 = vector.load %arg8[%c0_31, %c0_32, %c0_33] : memref<1x4x1xf32, #tpu.memory_space<vmem>>, vector<1x4x1xf32>
    tpu.vector_store %arg8[%c0_31, %c0_32, %c0_33], %29 {strides = array<i32>} : memref<1x4x1xf32, #tpu.memory_space<vmem>>, vector<1x4x1xf32>,
    %c0_34 = arith.constant 0 : index
    %c0_35 = arith.constant 0 : index
    %c0_36 = arith.constant 0 : index
    %50 = vector.load %arg9[%c0_34, %c0_35, %c0_36] : memref<1x4x1xf32, #tpu.memory_space<vmem>>, vector<1x4x1xf32>
    tpu.vector_store %arg9[%c0_34, %c0_35, %c0_36], %35 {strides = array<i32>} : memref<1x4x1xf32, #tpu.memory_space<vmem>>, vector<1x4x1xf32>,
    return
  }
  func.func @transform_0(%arg0: i32) -> (i32, i32, i32) {
    %c0_i32 = arith.constant 0 : i32
    %c0_i32_0 = arith.constant 0 : i32
    %c0_i32_1 = arith.constant 0 : i32
    %c0_i32_2 = arith.constant 0 : i32
    return %c0_i32, %c0_i32_0, %c0_i32_1 : i32, i32, i32
  }
  func.func @transform_1(%arg0: i32) -> (i32, i32, i32) {
    %c0_i32 = arith.constant 0 : i32
    %c0_i32_0 = arith.constant 0 : i32
    %c0_i32_1 = arith.constant 0 : i32
    %c0_i32_2 = arith.constant 0 : i32
    return %c0_i32, %c0_i32_0, %c0_i32_1 : i32, i32, i32
  }
  func.func @transform_2(%arg0: i32) -> (i32, i32, i32) {
    %c0_i32 = arith.constant 0 : i32
    %c0_i32_0 = arith.constant 0 : i32
    %c0_i32_1 = arith.constant 0 : i32
    %c0_i32_2 = arith.constant 0 : i32
    return %c0_i32, %c0_i32_0, %c0_i32_1 : i32, i32, i32
  }
  func.func @transform_3(%arg0: i32) -> (i32, i32, i32) {
    %c0_i32 = arith.constant 0 : i32
    %c0_i32_0 = arith.constant 0 : i32
    %c0_i32_1 = arith.constant 0 : i32
    %c0_i32_2 = arith.constant 0 : i32
    return %c0_i32, %c0_i32_0, %c0_i32_1 : i32, i32, i32
  }
  func.func @transform_4(%arg0: i32) -> (i32, i32, i32) {
    %c0_i32 = arith.constant 0 : i32
    %c0_i32_0 = arith.constant 0 : i32
    %c0_i32_1 = arith.constant 0 : i32
    %c0_i32_2 = arith.constant 0 : i32
    return %c0_i32, %c0_i32_0, %c0_i32_1 : i32, i32, i32
  }
  func.func @transform_5(%arg0: i32) -> (i32, i32, i32) {
    %c0_i32 = arith.constant 0 : i32
    %c0_i32_0 = arith.constant 0 : i32
    %c0_i32_1 = arith.constant 0 : i32
    %c0_i32_2 = arith.constant 0 : i32
    return %c0_i32, %c0_i32_0, %c0_i32_1 : i32, i32, i32
  }
  func.func @transform_6(%arg0: i32) -> (i32, i32, i32) {
    %c0_i32 = arith.constant 0 : i32
    %c0_i32_0 = arith.constant 0 : i32
    %c0_i32_1 = arith.constant 0 : i32
    %c0_i32_2 = arith.constant 0 : i32
    return %c0_i32, %c0_i32_0, %c0_i32_1 : i32, i32, i32
  }
  func.func @transform_7(%arg0: i32) -> (i32, i32, i32) {
    %c0_i32 = arith.constant 0 : i32
    %c0_i32_0 = arith.constant 0 : i32
    %c0_i32_1 = arith.constant 0 : i32
    %c0_i32_2 = arith.constant 0 : i32
    return %c0_i32, %c0_i32_0, %c0_i32_1 : i32, i32, i32
  }
  func.func @transform_8(%arg0: i32) -> (i32, i32, i32) {
    %c0_i32 = arith.constant 0 : i32
    %c0_i32_0 = arith.constant 0 : i32
    %c0_i32_1 = arith.constant 0 : i32
    %c0_i32_2 = arith.constant 0 : i32
    return %c0_i32, %c0_i32_0, %c0_i32_1 : i32, i32, i32
  }
}

</mosaic_0001>

<bundles_post_ra>
// kernel: tpu_custom_call.1
= control target key start
LH: loop header
LB: loop body
LE: loop exit
PB: predicated region body
PF: predicated region fallthrough
CT: control target
= control target key end

     0   :  { %v200_v1 = vmov 0   ;;  %s310_s0 = inlined_call_operand.vmem [shape: f32[2,4,256], index: 0, kind: input, shape index: {}]   ;;  %s311_s1 = inlined_call_operand.vmem [shape: f32[1,4,1], index: 1, kind: input, shape index: {}]   ;;  %s312_s2 = inlined_call_operand.vmem [shape: f32[1,4,1], index: 2, kind: input, shape index: {}]   ;;  %s313_s3 = inlined_call_operand.vmem [shape: f32[1,4,1], index: 3, kind: input, shape index: {}]   ;;  %s314_s4 = inlined_call_operand.vmem [shape: f32[1,4,1], index: 4, kind: input, shape index: {}]   ;;  %s315_s5 = inlined_call_operand.vmem [shape: f32[1,4,1], index: 5, kind: input, shape index: {}]   ;;  %s316_s6 = inlined_call_operand.hbm [shape: f32[2,4,256], index: 6, kind: output, shape index: {0}]   ;;  %s317_s7 = inlined_call_operand.vmem [shape: f32[1,4,1], index: 7, kind: output, shape index: {1}]   ;;  %s318_s8 = inlined_call_operand.vmem [shape: f32[1,4,1], index: 8, kind: output, shape index: {2}]  }
   0x1   :  { %v29_v0 = vld [vmem:[%s312_s2] sm:$0xf]  ;;  %168 = vset.pattern.permute.xlu0 %v200_v1  ;;  %169 = vset.pattern.permute.xlu1 %v200_v1 }
   0x2   :  { %32 = vperm.xlu0 %168, %v29_v0  }
   0x3   :  { %14 = vsyncpa [#allocation3], 0  ;;  %v201_v2 = vmov 839922192   ;;  %v37_v4 = vlaneseq  ;;  %v258_v9 = vld [vmem:[%s310_s0] sm:$0xff]  ;;  %v263_v10 = vld [vmem:[%s310_s0 + $0x8] sm:$0xff] }
   0x4   :  { %v35_v3 = vunpack.c.l.s4 %v201_v2  ;;  %vm50_vm0 = vcmask 1043456   ;;  %v83_v34 = vld [vmem:[%s311_s1] sm:$0xf]  ;;  %vm135_vm1 = vcmask 3072  }
   0x5   :  { %v38_v6 = vshrl.u32 %v37_v4, 7  ;;  %v162_v35 = vmul.f32 -1.442695, %v83_v34  ;;  %v94_v47 = vld [vmem:[%s313_s3] sm:$0xf] }
   0x6   :  { %v36_v5 = vunpack.c.0.s8 %v35_v3  ;;  %v100_v56 = vld [vmem:[%s314_s4] sm:$0xf] }
   0x7   :  { %170 = vpow2.f32 %v162_v35  ;;  %v102_v59 = vld [vmem:[%s315_s5] sm:$0xf] }
   0x8   :  { %v253_v7 = vsub.s32 %v36_v5, %v38_v6 }
  0x11   :  { %v171_v36 = vpop.eup %170 }
  0x12   :  { %v87_v37 = vadd.f32 1.0, %v171_v36 }
  0x14   :  { %172 = vrcp.f32 %v87_v37 }
  0x1e   :  { %v173_v38 = vpop.eup %172 }
  0x1f   :  { %v90_v39 = vsub.f32 1.0, %v173_v38 }
  0x21   :  { %v91_v42 = vmul.f32 %v90_v39, %v29_v0  ;;  %v95_v51 = vmul.f32 %v94_v47, %v90_v39 }
  0x81   :  { %v33_v8 = vpop.permute.xlu0 %32 }
  0x82   :  { %v40_v11 = vrot.slane %v33_v8, %v253_v7 }
  0x84   :  { %v42_v12 = vsub.f32 %v258_v9, %v40_v11  ;;  %v43_v13 = vsub.f32 %v263_v10, %v40_v11 }
  0x86   :  { %v46_v14 = vcombine.high %v42_v12, %v42_v12  ;;  %v62_v15 = vmul.f32 %v42_v12, %v42_v12  ;;  %v63_v16 = vmul.f32 %v43_v13, %v43_v13  ;;  %v47_v17 = vcombine.high %v43_v13, %v43_v13 }
  0x87   :  { %v51_v18 = vsel %vm50_vm0, %v42_v12, 0.0  ;;  %v54_v22 = vsel %vm50_vm0, %v43_v13, 0.0 }
  0x88   :  { %v52_v19 = vsel %vm50_vm0, %v46_v14, 0.0  ;;  %v66_v21 = vcombine.high %v62_v15, %v62_v15  ;;  %v67_v24 = vcombine.high %v63_v16, %v63_v16  ;;  %v70_v25 = vsel %vm50_vm0, %v62_v15, 0.0 }
  0x89   :  { %v53_v20 = vadd.f32 %v52_v19, %v51_v18  ;;  %v56_v27 = vsel %vm50_vm0, %v47_v17, 0.0  ;;  %v73_v30 = vsel %vm50_vm0, %v63_v16, 0.0 }
  0x8a   :  { %v71_v26 = vsel %vm50_vm0, %v66_v21, 0.0  ;;  %v75_v32 = vsel %vm50_vm0, %v67_v24, 0.0 }
  0x8b   :  { %v55_v23 = vadd.f32 %v54_v22, %v53_v20  ;;  %v72_v28 = vadd.f32 %v71_v26, %v70_v25 }
  0x8d   :  { %v57_v29 = vadd.f32 %v56_v27, %v55_v23  ;;  %v74_v31 = vadd.f32 %v73_v30, %v72_v28 }
  0x8f   :  { %58 = vadd.xlane.f32.xlu0 %v57_v29  ;;  %v76_v33 = vadd.f32 %v75_v32, %v74_v31 }
  0x91   :  { %77 = vadd.xlane.f32.xlu1 %v76_v33 }
 0x11c   :  { %v59_v40 = vpop.xlane.xlu0 %58 }
 0x11d   :  { %v60_v41 = vmul.f32 0.001953125, %v59_v40 }
 0x11e   :  { %v78_v45 = vpop.xlane.xlu1 %77 }
 0x11f   :  { %v61_v43 = vadd.f32 %v60_v41, %v29_v0  ;;  %v80_v44 = vmul.f32 %v60_v41, %v60_v41  ;;  %v79_v46 = vmul.f32 0.001953125, %v78_v45 }
 0x121   :  { %v92_v48 = vmul.f32 %v173_v38, %v61_v43  ;;  %v81_v49 = vsub.f32 %v79_v46, %v80_v44 }
 0x123   :  { %v93_v50 = vadd.f32 %v92_v48, %v91_v42  ;;  %v82_v52 = vmax.f32 %v81_v49, 0.0 }
 0x125   :  { %136 = vst.msk [vmem:[%s317_s7] sm:$0xf] %vm135_vm1, %v93_v50  ;;  %v96_v53 = vmul.f32 %v173_v38, %v82_v52  ;;  %s202_s7 = smov [#allocation2]  }
 0x127   :  { %v97_v54 = vadd.f32 %v96_v53, %v95_v51 }
 0x129   :  { %v98_v55 = vadd.f32 1e-05, %v97_v54  ;;  %137 = vst.msk [vmem:[%s318_s8] sm:$0xf] %vm135_vm1, %v97_v54  ;;  %s143_s8 = sshll.u32 %s202_s7, 4  ;;  %s144_s8 = int_to_ptr.vmem [resolvable:$true] %s143_s8 }
 0x12a   :  { %s176_s4 = scalar_lea.vmem %s144_s8, 256  ;;  %p181_p1 = scmp.lt.s32.totalorder %s144_s8, %s144_s8 }
 0x12b   :  { %174 = vrsqrt.f32 %v98_v55  ;;  %p177_p0 = scmp.ne.s32.totalorder %s144_s8, %s176_s4  ;;  %p182_p2 = scmp.lt.s32.totalorder %s176_s4, %s176_s4 }
 0x12d   :  { %p183_p3 = por %p182_p2, %p181_p1 }
 0x12f   :  { %p184_p4 = pnand %p183_p3, %p177_p0 }
 0x135   :  { %v175_v57 = vpop.eup %174 }
 0x136   :  { %v101_v58 = vmul.f32 %v175_v57, %v100_v56 }
 0x138   :  { %107 = vperm.xlu1 %169, %v101_v58   ;;  %v103_v60 = vmul.f32 %v101_v58, %v93_v50 }
 0x13a   :  { %v104_v61 = vsub.f32 %v102_v59, %v103_v60 }
 0x13c   :  { %121 = vperm.xlu1 %169, %v104_v61  }
 0x1b7   :  { %v108_v62 = vpop.permute.xlu1 %107 }
 0x1b8   :  { %v115_v63 = vrot.slane %v108_v62, %v253_v7 }
 0x1ba   :  { %v117_v1 = vmul.f32 %v115_v63, %v258_v9  ;;  %v118_v2 = vmul.f32 %v115_v63, %v263_v10 }
 0x1bb   :  { %v122_v0 = vpop.permute.xlu1 %121 }
 0x1bc   :  { %v129_v3 = vrot.slane %v122_v0, %v253_v7 }
 0x1be   :  { %v131_v4 = vadd.f32 %v129_v3, %v117_v1  ;;  %v132_v5 = vadd.f32 %v129_v3, %v118_v2 }
 0x1c0   :  { %133 = vst [vmem:[#allocation2] sm:$0xff] %v131_v4  ;;  %134 = vst [vmem:[#allocation2 + $0x8] sm:$0xff] %v132_v5 }
 0x1c1   :  { %187 = shalt.err (!%p184_p4)
}
 0x1c2   :  { %s188_s20 = scalar_lea.hbm %s316_s6, 256 }
 0x1c3   :  { %p189_p5 = scmp.ne.s32.totalorder %s316_s6, %s188_s20  ;;  %p192_p6 = scmp.lt.u32.totalorder %s188_s20, %s316_s6 }
 0x1c5   :  { %p194_p7 = pnand %p192_p6, %p189_p5 }
 0x1c7   :  { %197 = shalt.err (!%p194_p7)
}
 0x1c8   :  { %s203_s25 = smov 128   ;;  %s204_s26 = smov 8  }
 0x1c9   :  { %149 = dma.vmem_to_hbm [thread:$0]  %s144_s8, 256, %s316_s6, [#allocation3], %s203_s25, %s203_s25, %s204_s26  }
 0x1ca   :  { %198 = dma.done.wait [#allocation3], 256  }
 0x1cb   :  { %199 = vsyncadd [#allocation3], 4294967040 }
 0x1cc   :  { %161 = vsyncpa [#allocation3], 1 }

</bundles_post_ra>
